<compile_context>
chip_gen: v6e
topology: v6e:2x2x1
jax: 0.10.0
libtpu: 0.0.40
codegen_flags: <defaults>
</compile_context>

<pallas_src>
import functools

import jax
import jax.numpy as jnp
from jax.experimental import pallas as pl
from jax.experimental.pallas import tpu as pltpu


OUT_PAD = 128  # lane-dense padded width for the layer-2 / log_softmax output


# ----------------------------- Pallas kernel --------------------------------

def fused_net_kernel(a_ref, x_ref, w1_ref, b1_ref, wlr2_ref, b2_ref, o_ref,
                     *, out_ch):
    a = a_ref[...]          # bf16 (N, N)   normalized adjacency
    x = x_ref[...]          # bf16 (N, IN)  node features

    # ---- layer 1: SAGEConv(in, 128) + ReLU ---------------------------------
    # agg[i] = mean over incoming neighbors of x[j]  (dense matmul on MXU)
    agg = jnp.dot(a, x, preferred_element_type=jnp.float32)        # f32 (N, IN)
    # Fused lin_l/lin_r: concat([agg, x]) @ vstack([W_l1, W_r1]) -> one K=2*IN
    h_in = jnp.concatenate([agg.astype(jnp.bfloat16), x], axis=-1)  # (N, 2*IN)
    h = jnp.dot(h_in, w1_ref[...], preferred_element_type=jnp.float32) + b1_ref[...]
    h = jnp.maximum(h, 0.0)                                         # f32 (N, 128)
    # TODO(synk): F.dropout(p=0.5, training=True) is stochastic; modeled here
    # in eval mode (identity), matching module.eval() semantics.

    # ---- layer 2: SAGEConv(128, out), re-associated as A @ (h @ W_l) -------
    # wlr2 = [W_l_pad | W_r_pad]  -> single K=128, 256-wide matmul for both
    # branches; split kept on the 128-lane boundary.
    h_bf = h.astype(jnp.bfloat16)
    t = jnp.dot(h_bf, wlr2_ref[...], preferred_element_type=jnp.float32)  # (N, 2*OUT_PAD)
    t_l = t[:, :OUT_PAD]
    t_r = t[:, OUT_PAD:]
    logits = (jnp.dot(a, t_l.astype(jnp.bfloat16),
                      preferred_element_type=jnp.float32)
              + t_r + b2_ref[...])                                  # f32 (N, OUT_PAD)

    # ---- log_softmax over the first `out_ch` (valid) lanes ------------------
    col = jax.lax.broadcasted_iota(jnp.int32, logits.shape, 1)
    valid = col < out_ch
    masked = jnp.where(valid, logits, jnp.float32(-1e30))
    m = jnp.max(masked, axis=-1, keepdims=True)
    # exponentiate the masked value so padded lanes can never overflow to inf
    e = jnp.where(valid, jnp.exp(masked - m), 0.0)
    s = jnp.sum(e, axis=-1, keepdims=True)
    o_ref[...] = (logits - m - jnp.log(s)).astype(o_ref.dtype)


# ----------------------------- wrappers --------------------------------------

def prepare_params(params):
    """One-time parameter prep (outside the hot path): stack layer-1 weights
    for the fused K=2*IN matmul, pad+fuse layer-2 weights to a lane-dense
    128-wide slab, cast matmul weights to bf16 (biases stay f32)."""
    (wl1, bl1, wr1), (wl2, bl2, wr2) = params
    out_ch = wl2.shape[1]
    # layer 1: W1 = vstack([W_l1, W_r1])  -> one fused matmul with [agg | x]
    w1 = jnp.concatenate([wl1, wr1], axis=0).astype(jnp.bfloat16)   # (2*IN, 128)
    # layer 2: zero-pad to OUT_PAD lanes and fuse [W_l | W_r]
    wl2p = jnp.zeros((wl2.shape[0], OUT_PAD), jnp.float32).at[:, :out_ch].set(wl2)
    wr2p = jnp.zeros((wr2.shape[0], OUT_PAD), jnp.float32).at[:, :out_ch].set(wr2)
    wlr2 = jnp.concatenate([wl2p, wr2p], axis=1).astype(jnp.bfloat16)  # (128, 2*OUT_PAD)
    b2p = jnp.zeros((1, OUT_PAD), jnp.float32).at[:, :out_ch].set(bl2)
    return {
        "w1": w1,
        "b1": bl1.reshape(1, -1).astype(jnp.float32),
        "wlr2": wlr2,
        "b2": b2p,
    }


def net_forward(prepared, a_norm, x, *, out_ch):
    n = x.shape[0]
    # bf16 MXU operands (f32 accumulation inside the kernel)
    a_bf = a_norm.astype(jnp.bfloat16)
    x_bf = x.astype(jnp.bfloat16)
    w1 = prepared["w1"]
    b1 = prepared["b1"]
    wlr2 = prepared["wlr2"]
    b2 = prepared["b2"]

    kernel = functools.partial(fused_net_kernel, out_ch=out_ch)
    out_pad = pl.pallas_call(
        kernel,
        out_shape=jax.ShapeDtypeStruct((n, OUT_PAD), jnp.float32),
        in_specs=[
            pl.BlockSpec(a_bf.shape, lambda: (0, 0)),
            pl.BlockSpec(x_bf.shape, lambda: (0, 0)),
            pl.BlockSpec(w1.shape, lambda: (0, 0)),
            pl.BlockSpec(b1.shape, lambda: (0, 0)),
            pl.BlockSpec(wlr2.shape, lambda: (0, 0)),
            pl.BlockSpec(b2.shape, lambda: (0, 0)),
        ],
        out_specs=pl.BlockSpec((n, OUT_PAD), lambda: (0, 0)),
        compiler_params=pltpu.CompilerParams(vmem_limit_bytes=32 << 20),
    )(a_bf, x_bf, w1, b1, wlr2, b2)
    # slice the lane-dense 128-wide slab back to the real output width
    return out_pad[:, :out_ch]


def build_norm_adjacency(edge_index, num_nodes):
    # A[i, j] = number of edges j -> i ; mean aggregation divides by in-degree
    src = edge_index[0]
    dst = edge_index[1]
    a = jnp.zeros((num_nodes, num_nodes), jnp.float32)
    a = a.at[dst, src].add(1.0)
    deg = jnp.sum(a, axis=1, keepdims=True)
    return a / jnp.maximum(deg, 1.0)


def init_linear(key, fan_in, fan_out, with_bias):
    # PyTorch Linear default init: U(-1/sqrt(fan_in), 1/sqrt(fan_in))
    kw, kb = jax.random.split(key)
    bound = 1.0 / jnp.sqrt(jnp.float32(fan_in))
    w = jax.random.uniform(kw, (fan_in, fan_out), jnp.float32, -bound, bound)
    b = (jax.random.uniform(kb, (fan_out,), jnp.float32, -bound, bound)
         if with_bias else jnp.zeros((fan_out,), jnp.float32))
    return w, b


# ----------------------------- main ------------------------------------------

if __name__ == "__main__":
    N = 64           # number of nodes
    E = 256          # number of edges
    IN_CH = 32
    HIDDEN = 128
    OUT_CH = 16

    key = jax.random.PRNGKey(0)
    kx, ke_src, ke_dst, k1l, k1r, k2l, k2r = jax.random.split(key, 7)

    x = jax.random.normal(kx, (N, IN_CH), jnp.float32)
    edge_index = jnp.stack([
        jax.random.randint(ke_src, (E,), 0, N),
        jax.random.randint(ke_dst, (E,), 0, N),
    ], axis=0)  # [2, E], row 0 = source, row 1 = target

    # SAGEConv params: lin_l (with bias) acts on the aggregated neighbors,
    # lin_r (no bias) acts on the root node features.
    wl1, bl1 = init_linear(k1l, IN_CH, HIDDEN, with_bias=True)
    wr1, _ = init_linear(k1r, IN_CH, HIDDEN, with_bias=False)
    wl2, bl2 = init_linear(k2l, HIDDEN, OUT_CH, with_bias=True)
    wr2, _ = init_linear(k2r, HIDDEN, OUT_CH, with_bias=False)
    params = ((wl1, bl1, wr1), (wl2, bl2, wr2))

    # Hoisted out of the forward pass: adjacency (once per graph) and padded /
    # stacked / bf16-cast params (once per model).
    a_norm = build_norm_adjacency(edge_index, N)
    prepared = prepare_params(params)

    fwd = jax.jit(functools.partial(net_forward, out_ch=OUT_CH))
    out = fwd(prepared, a_norm, x)
    out = jax.block_until_ready(out)
    assert out.shape == (N, OUT_CH)

    # --- check 1: tight, against a bf16-operand / f32-accum mirrored ref -----
    a_bf = a_norm.astype(jnp.bfloat16)
    x_bf = x.astype(jnp.bfloat16)
    agg_m = jnp.dot(a_bf, x_bf, preferred_element_type=jnp.float32)
    h_m = (jnp.dot(agg_m.astype(jnp.bfloat16), wl1.astype(jnp.bfloat16),
                   preferred_element_type=jnp.float32)
           + jnp.dot(x_bf, wr1.astype(jnp.bfloat16),
                     preferred_element_type=jnp.float32)
           + bl1)
    h_m = jnp.maximum(h_m, 0.0)
    h_mb = h_m.astype(jnp.bfloat16)
    tl_m = jnp.dot(h_mb, wl2.astype(jnp.bfloat16), preferred_element_type=jnp.float32)
    tr_m = jnp.dot(h_mb, wr2.astype(jnp.bfloat16), preferred_element_type=jnp.float32)
    logits_m = (jnp.dot(a_bf, tl_m.astype(jnp.bfloat16),
                        preferred_element_type=jnp.float32)
                + tr_m + bl2)
    ref_mirror = jax.nn.log_softmax(logits_m, axis=-1)
    assert jnp.allclose(out, ref_mirror, atol=2e-3, rtol=2e-3)

    # --- check 2: loose, against the pure-f32 un-fused reference -------------
    h_ref = jnp.maximum(a_norm @ x @ wl1 + bl1 + x @ wr1, 0.0)
    h_ref = a_norm @ h_ref @ wl2 + bl2 + h_ref @ wr2
    ref_f32 = jax.nn.log_softmax(h_ref, axis=-1)
    assert jnp.allclose(out, ref_f32, atol=1e-1, rtol=1e-1)

    print("KERNEL_OK")
</pallas_src>

<mosaic_0001>
module attributes {stable_mosaic.version = 11 : i64} {
  func.func @fused_net_kernel(%arg0: memref<64x64xbf16, #tpu.memory_space<vmem>>, %arg1: memref<64x32xbf16, #tpu.memory_space<vmem>>, %arg2: memref<64x128xbf16, #tpu.memory_space<vmem>>, %arg3: memref<1x128xf32, #tpu.memory_space<vmem>>, %arg4: memref<128x256xbf16, #tpu.memory_space<vmem>>, %arg5: memref<1x128xf32, #tpu.memory_space<vmem>>, %arg6: memref<64x128xf32, #tpu.memory_space<vmem>>) attributes {dimension_semantics = [], scalar_prefetch = 0 : i64, scratch_operands = 0 : i64, tpu.core_type = #tpu.core_type<tc>} {
    %c0 = arith.constant 0 : index
    %c0_0 = arith.constant 0 : index
    %0 = vector.load %arg0[%c0, %c0_0] : memref<64x64xbf16, #tpu.memory_space<vmem>>, vector<64x64xbf16>
    %c0_1 = arith.constant 0 : index
    %c0_2 = arith.constant 0 : index
    %1 = vector.load %arg1[%c0_1, %c0_2] : memref<64x32xbf16, #tpu.memory_space<vmem>>, vector<64x32xbf16>
    %cst = arith.constant dense<0.000000e+00> : vector<64x32xf32>
    %2 = tpu.matmul %0, %1, %cst {dimension_numbers = #tpu.dot_dimension_numbers<[1], [0], [0], [1], [0, 0, 1, 1], [], []>} : vector<64x64xbf16>, vector<64x32xbf16>, vector<64x32xf32> -> vector<64x32xf32>
    %3 = arith.truncf %2 : vector<64x32xf32> to vector<64x32xbf16>
    %4 = tpu.concatenate %3, %1 in 1 : vector<64x32xbf16>, vector<64x32xbf16> -> vector<64x64xbf16>
    %c0_3 = arith.constant 0 : index
    %c0_4 = arith.constant 0 : index
    %5 = vector.load %arg2[%c0_3, %c0_4] : memref<64x128xbf16, #tpu.memory_space<vmem>>, vector<64x128xbf16>
    %cst_5 = arith.constant dense<0.000000e+00> : vector<64x128xf32>
    %6 = tpu.matmul %4, %5, %cst_5 {dimension_numbers = #tpu.dot_dimension_numbers<[1], [0], [0], [1], [0, 0, 1, 1], [], []>} : vector<64x64xbf16>, vector<64x128xbf16>, vector<64x128xf32> -> vector<64x128xf32>
    %c0_6 = arith.constant 0 : index
    %c0_7 = arith.constant 0 : index
    %7 = vector.load %arg3[%c0_6, %c0_7] : memref<1x128xf32, #tpu.memory_space<vmem>>, vector<1x128xf32>
    %8 = vector.broadcast %7 : vector<1x128xf32> to vector<64x128xf32>
    %9 = arith.addf %6, %8 : vector<64x128xf32>
    %cst_8 = arith.constant 0.000000e+00 : f32
    %10 = vector.broadcast %cst_8 : f32 to vector<64x128xf32>
    %11 = arith.maximumf %9, %10 : vector<64x128xf32>
    %12 = arith.truncf %11 : vector<64x128xf32> to vector<64x128xbf16>
    %c0_9 = arith.constant 0 : index
    %c0_10 = arith.constant 0 : index
    %13 = vector.load %arg4[%c0_9, %c0_10] : memref<128x256xbf16, #tpu.memory_space<vmem>>, vector<128x256xbf16>
    %cst_11 = arith.constant dense<0.000000e+00> : vector<64x256xf32>
    %14 = tpu.matmul %12, %13, %cst_11 {dimension_numbers = #tpu.dot_dimension_numbers<[1], [0], [0], [1], [0, 0, 1, 1], [], []>} : vector<64x128xbf16>, vector<128x256xbf16>, vector<64x256xf32> -> vector<64x256xf32>
    %15 = vector.extract_strided_slice %14 {offsets = [0, 0], sizes = [64, 128], strides = [1, 1]} : vector<64x256xf32> to vector<64x128xf32>
    %16 = vector.extract_strided_slice %14 {offsets = [0, 128], sizes = [64, 128], strides = [1, 1]} : vector<64x256xf32> to vector<64x128xf32>
    %17 = arith.truncf %15 : vector<64x128xf32> to vector<64x128xbf16>
    %cst_12 = arith.constant dense<0.000000e+00> : vector<64x128xf32>
    %18 = tpu.matmul %0, %17, %cst_12 {dimension_numbers = #tpu.dot_dimension_numbers<[1], [0], [0], [1], [0, 0, 1, 1], [], []>} : vector<64x64xbf16>, vector<64x128xbf16>, vector<64x128xf32> -> vector<64x128xf32>
    %19 = arith.addf %18, %16 : vector<64x128xf32>
    %c0_13 = arith.constant 0 : index
    %c0_14 = arith.constant 0 : index
    %20 = vector.load %arg5[%c0_13, %c0_14] : memref<1x128xf32, #tpu.memory_space<vmem>>, vector<1x128xf32>
    %21 = vector.broadcast %20 : vector<1x128xf32> to vector<64x128xf32>
    %22 = arith.addf %19, %21 : vector<64x128xf32>
    %23 = tpu.iota {dimensions = array<i32: 1>} : vector<64x128xi32>
    %c16_i32 = arith.constant 16 : i32
    %24 = vector.broadcast %c16_i32 : i32 to vector<64x128xi32>
    %25 = arith.cmpi slt, %23, %24 : vector<64x128xi32>
    %cst_15 = arith.constant -1.000000e+30 : f32
    %26 = vector.broadcast %cst_15 : f32 to vector<64x128xf32>
    %27 = arith.select %25, %22, %26 : vector<64x128xi1>, vector<64x128xf32>
    %cst_16 = arith.constant dense<0xFF800000> : vector<64xf32>
    %28 = vector.multi_reduction <maximumf>, %27, %cst_16 [1] : vector<64x128xf32> to vector<64xf32>
    %29 = vector.shape_cast %28 : vector<64xf32> to vector<64x1xf32>
    %30 = vector.broadcast %29 : vector<64x1xf32> to vector<64x128xf32>
    %31 = arith.subf %27, %30 : vector<64x128xf32>
    %32 = math.exp %31 : vector<64x128xf32>
    %cst_17 = arith.constant 0.000000e+00 : f32
    %33 = vector.broadcast %cst_17 : f32 to vector<64x128xf32>
    %34 = arith.select %25, %32, %33 : vector<64x128xi1>, vector<64x128xf32>
    %cst_18 = arith.constant dense<0.000000e+00> : vector<64xf32>
    %35 = vector.multi_reduction <add>, %34, %cst_18 [1] : vector<64x128xf32> to vector<64xf32>
    %36 = vector.shape_cast %35 : vector<64xf32> to vector<64x1xf32>
    %37 = vector.broadcast %29 : vector<64x1xf32> to vector<64x128xf32>
    %38 = arith.subf %22, %37 : vector<64x128xf32>
    %39 = math.log %36 : vector<64x1xf32>
    %40 = vector.broadcast %39 : vector<64x1xf32> to vector<64x128xf32>
    %41 = arith.subf %38, %40 : vector<64x128xf32>
    %c0_19 = arith.constant 0 : index
    %c0_20 = arith.constant 0 : index
    %42 = vector.load %arg6[%c0_19, %c0_20] : memref<64x128xf32, #tpu.memory_space<vmem>>, vector<64x128xf32>
    tpu.vector_store %arg6[%c0_19, %c0_20], %41 {strides = array<i32>} : memref<64x128xf32, #tpu.memory_space<vmem>>, vector<64x128xf32>,
    return
  }
}

</mosaic_0001>

<bundles_post_ra>
// kernel: net_forward.1
= control target key start
LH: loop header
LB: loop body
LE: loop exit
PB: predicated region body
PF: predicated region fallthrough
CT: control target
= control target key end

     0   :  { %11 = vsyncpa [#allocation3], 0  ;;  %s907_s21 = smov [#allocation2]   ;;  %s1183_s0 = inlined_call_operand.vmem [shape: bf16[64,64], index: 0, kind: input, shape index: {}]   ;;  %s1184_s1 = inlined_call_operand.vmem [shape: bf16[64,32], index: 1, kind: input, shape index: {}]   ;;  %s1185_s2 = inlined_call_operand.hbm [shape: bf16[64,128], index: 2, kind: input, shape index: {}]   ;;  %s1186_s3 = inlined_call_operand.vmem [shape: f32[1,128], index: 3, kind: input, shape index: {}]   ;;  %s1187_s4 = inlined_call_operand.vmem [shape: bf16[128,256], index: 4, kind: input, shape index: {}]   ;;  %s1188_s5 = inlined_call_operand.vmem [shape: f32[1,128], index: 5, kind: input, shape index: {}]   ;;  %s1189_s6 = inlined_call_operand.vmem [shape: f32[64,128], index: 6, kind: output, shape index: {}]  }
   0x1   :  { %s21_s22 = sshll.u32 %s907_s21, 4  ;;  %s22_s22 = int_to_ptr.vmem [resolvable:$true] %s21_s22 }
   0x2   :  { %s893_s23 = scalar_lea.vmem %s22_s22, 512  ;;  %p898_p1 = scmp.lt.s32.totalorder %s22_s22, %s22_s22 }
   0x3   :  { %p894_p0 = scmp.ne.s32.totalorder %s22_s22, %s893_s23  ;;  %p899_p2 = scmp.lt.s32.totalorder %s893_s23, %s893_s23 }
   0x5   :  { %p900_p3 = por %p899_p2, %p898_p1 }
   0x7   :  { %p901_p4 = pnand %p900_p3, %p894_p0 }
   0x9   :  { %904 = shalt.err (!%p901_p4)
}
   0xa   :  { %s908_s24 = smov 64   ;;  %s909_s25 = smov 4  }
   0xb   :  { %27 = dma.hbm_to_vmem [thread:$0]  %s1185_s2, 512, %s22_s22, [#allocation3], %s908_s24, %s908_s24, %s909_s25  }
   0xc   :  { %905 = dma.done.wait [#allocation3], 512  }
   0xd   :  { %906 = vsyncadd [#allocation3], 4294966784  ;;  %v817_v0 = vld [vmem:[%s1184_s1 + $0x18] sm:$0xff]   ;;  %v818_v1 = vld [vmem:[%s1184_s1 + $0x10] sm:$0xff]   ;;  %vm98_vm0 = vcmask 523264   ;;  %s910_s2 = smov 32  }
   0xe   :  { %764 = vmatprep.subr.bf16.mxu1 %v817_v0  ;;  %v819_v2 = vld [vmem:[%s1184_s1 + $0x8] sm:$0xff]   ;;  %v820_v3 = vld [vmem:[%s1184_s1] sm:$0xff]   ;;  %184 = vrot.lane.b32.xlu1 %v818_v1, %s910_s2  ;;  %v825_v5 = vld [vmem:[#allocation2 + $0x18] sm:$0xff]   ;;  %vm188_vm1 = vcmask 261120   ;;  %v911_v48 = vmov 0  }
   0xf   :  { %765 = vmatpush3.bf16.msra.mxu1 %v817_v0  ;;  %v965_v4 = vld [vmem:[%s1183_s0] sm:$0xff]   ;;  %180 = vrot.lane.b32.xlu0 %v820_v3, %s910_s2  ;;  %v972_v6 = vld [vmem:[%s1183_s0 + $0x8] sm:$0xff]   ;;  %v977_v7 = vld [vmem:[%s1183_s0 + $0x10] sm:$0xff]  }
  0x10   :  { %766 = vmatprep.subr.bf16.mxu1 %v818_v1  ;;  %772 = vmatprep.mubr.msk.bf16.mxu1 %vm98_vm0, %v965_v4  ;;  %v826_v8 = vld [vmem:[#allocation2 + $0x10] sm:$0xff]   ;;  %v986_v9 = vld [vmem:[%s1183_s0 + $0x18] sm:$0xff]   ;;  %v827_v10 = vld [vmem:[#allocation2 + $0x8] sm:$0xff]  }
  0x11   :  { %v828_v11 = vld [vmem:[#allocation2] sm:$0xff]   ;;  %v829_v12 = vld [vmem:[%s1187_s4 + $0x74] ss:$8 sps:$4 sm:$0xff]   ;;  %v831_v13 = vld [vmem:[%s1187_s4 + $0x70] ss:$8 sps:$4 sm:$0xff]   ;;  %453 = vmatprep.mubr.bf16.mxu0 %v911_v48 }
  0x12   :  { %186 = vrot.lane.b32.xlu1 %v817_v0, %s910_s2  ;;  %v832_v14 = vld [vmem:[%s1187_s4 + $0x64] ss:$8 sps:$4 sm:$0xff]   ;;  %421 = vmatprep.subr.bf16.mxu0 %v829_v12  ;;  %v834_v15 = vld [vmem:[%s1187_s4 + $0x60] ss:$8 sps:$4 sm:$0xff]   ;;  %v835_v16 = vld [vmem:[%s1187_s4 + $0x54] ss:$8 sps:$4 sm:$0xff]  }
  0x13   :  { %767 = vmatpush3.bf16.msra.mxu1 %v818_v1  ;;  %182 = vrot.lane.b32.xlu0 %v819_v2, %s910_s2  ;;  %v837_v17 = vld [vmem:[%s1187_s4 + $0x50] ss:$8 sps:$4 sm:$0xff]   ;;  %v838_v18 = vld [vmem:[%s1187_s4 + $0x44] ss:$8 sps:$4 sm:$0xff]   ;;  %v840_v19 = vld [vmem:[%s1187_s4 + $0x40] ss:$8 sps:$4 sm:$0xff]  }
  0x14   :  { %768 = vmatprep.subr.bf16.mxu1 %v819_v2  ;;  %422 = vmatpush1.bf16.msra.mxu0 %v831_v13  ;;  %v841_v20 = vld [vmem:[%s1187_s4 + $0x34] ss:$8 sps:$4 sm:$0xff]   ;;  %v843_v21 = vld [vmem:[%s1187_s4 + $0x30] ss:$8 sps:$4 sm:$0xff]   ;;  %v844_v42 = vld [vmem:[%s1187_s4 + $0x24] ss:$8 sps:$4 sm:$0xff]  }
  0x15   :  { %423 = vmatprep.subr.bf16.mxu0 %v832_v14  ;;  %v846_v43 = vld [vmem:[%s1187_s4 + $0x20] ss:$8 sps:$4 sm:$0xff]   ;;  %v847_v44 = vld [vmem:[%s1187_s4 + $0x14] ss:$8 sps:$4 sm:$0xff]   ;;  %v849_v45 = vld [vmem:[%s1187_s4 + $0x10] ss:$8 sps:$4 sm:$0xff]  }
  0x16   :  { %v850_v46 = vld [vmem:[%s1187_s4 + $0x4] ss:$8 sps:$4 sm:$0xff]   ;;  %v852_v47 = vld [vmem:[%s1187_s4] ss:$8 sps:$4 sm:$0xff]  }
  0x17   :  { %769 = vmatpush3.bf16.msra.mxu1 %v819_v2  ;;  %v710_v51 = vld [vmem:[%s1186_s3] ss:$0 sm:$0xff] }
  0x18   :  { %770 = vmatprep.subr.bf16.mxu1 %v820_v3  ;;  %424 = vmatpush1.bf16.msra.mxu0 %v834_v15 }
  0x19   :  { %425 = vmatprep.subr.bf16.mxu0 %v835_v16 }
  0x1b   :  { %771 = vmatpush3.bf16.msra.mxu1 %v820_v3 }
  0x1c   :  { %780 = vmatprep.subr.bf16.mxu1 %v825_v5  ;;  %426 = vmatpush1.bf16.msra.mxu0 %v837_v17 }
  0x1d   :  { %427 = vmatprep.subr.bf16.mxu0 %v838_v18 }
  0x1e   :  { %773 = vmatmul.mubr.msk.bf16.vlgmr.msra.gmra.mxu1 %vm98_vm0, %v972_v6 }
  0x1f   :  { %776 = vmatprep.mubr.msk.bf16.mxu1 %vm98_vm0, %v977_v7  ;;  %781 = vmatpush3.bf16.msra.mxu1 %v825_v5 }
  0x20   :  { %782 = vmatprep.subr.bf16.mxu1 %v826_v8  ;;  %428 = vmatpush1.bf16.msra.mxu0 %v840_v19 }
  0x21   :  { %429 = vmatprep.subr.bf16.mxu0 %v841_v20 }
  0x23   :  { %783 = vmatpush3.bf16.msra.mxu1 %v826_v8 }
  0x24   :  { %784 = vmatprep.subr.bf16.mxu1 %v827_v10  ;;  %430 = vmatpush1.bf16.msra.mxu0 %v843_v21 }
  0x25   :  { %431 = vmatprep.subr.bf16.mxu0 %v844_v42 }
  0x26   :  { %777 = vmatmul.mubr.msk.bf16.gmra.mxu1 %vm98_vm0, %v986_v9 }
  0x27   :  { %785 = vmatpush3.bf16.msra.mxu1 %v827_v10 }
  0x28   :  { %786 = vmatprep.subr.bf16.mxu1 %v828_v11  ;;  %432 = vmatpush1.bf16.msra.mxu0 %v846_v43 }
  0x29   :  { %433 = vmatprep.subr.bf16.mxu0 %v847_v44 }
  0x2b   :  { %787 = vmatpush3.bf16.msra.mxu1 %v828_v11 }
  0x2c   :  { %434 = vmatpush1.bf16.msra.mxu0 %v849_v45 }
  0x2d   :  { %435 = vmatprep.subr.bf16.mxu0 %v850_v46 }
  0x30   :  { %436 = vmatpush1.bf16.msra.mxu0 %v852_v47 }
  0x80   :  { %v185_v30 = vpop.permute.xlu1 %184 }
  0x81   :  { %v181_v23 = vpop.permute.xlu0 %180 }
  0x84   :  { %v187_v37 = vpop.permute.xlu1 %186 }
  0x85   :  { %v183_v28 = vpop.permute.xlu0 %182 }
  0xde   :  { %v774_v22 = vpop.f32.mrf.mxu1 }
  0xe0   :  { %v145_v24 = vpop.f32.mrf.mxu1 }
  0xe2   :  { %v775_v25 = vpop.f32.mrf.mxu1 }
  0xe3   :  { %v177_v26 = vpack.c.bf16 %v775_v25, %v774_v22 }
  0xe4   :  { %v148_v27 = vpop.f32.mrf.mxu1 }
  0xe5   :  { %v176_v29 = vpack.c.bf16 %v148_v27, %v145_v24  ;;  %v194_v33 = vsel %vm188_vm1, %v177_v26, %v183_v28 }
  0xe6   :  { %v778_v31 = vpop.f32.mrf.mxu1 }
  0xe7   :  { %v191_v32 = vsel %vm188_vm1, %v176_v29, %v181_v23 }
  0xe8   :  { %v161_v34 = vpop.f32.mrf.mxu1  ;;  %788 = vmatprep.mubr.msk.bf16.mxu1 %vm98_vm0, %v191_v32 }
  0xe9   :  { %789 = vmatmul.mubr.msk.bf16.vlgmr.msra.gmra.mxu1 %vm98_vm0, %v194_v33 }
  0xea   :  { %v779_v35 = vpop.f32.mrf.mxu1 }
  0xeb   :  { %v179_v36 = vpack.c.bf16 %v779_v35, %v778_v31 }
  0xec   :  { %v164_v38 = vpop.f32.mrf.mxu1 }
  0xed   :  { %v178_v39 = vpack.c.bf16 %v164_v38, %v161_v34  ;;  %v200_v40 = vsel %vm188_vm1, %v179_v36, %v187_v37  ;;  %v578_v36 = vlaneseq }
  0xef   :  { %v197_v41 = vsel %vm188_vm1, %v178_v39, %v185_v30  ;;  %v1057_v37 = vand.u32 127, %v578_v36  ;;  %v739_v39 = vld [vmem:[%s1188_s5] ss:$0 sm:$0xff] }
  0xf0   :  { %792 = vmatprep.mubr.msk.bf16.mxu1 %vm98_vm0, %v197_v41 }
  0xf1   :  { %793 = vmatmul.mubr.msk.bf16.gmra.mxu1 %vm98_vm0, %v200_v40  ;;  %vm580_vm2 = vcmp.lt.s32.totalorder %v1057_v37, 16 }
  0xf2   :  { %804 = vmatprep.mubr.msk.bf16.mxu1 %vm98_vm0, %v965_v4 }
 0x1a9   :  { %v790_v49 = vpop.f32.mrf.mxu1 }
 0x1aa   :  { %v291_v63 = vadd.f32 %v790_v49, %v710_v51 }
 0x1ab   :  { %v282_v50 = vpop.f32.mrf.mxu1 }
 0x1ac   :  { %v283_v53 = vadd.f32 %v710_v51, %v282_v50  ;;  %v315_v2 = vmax.f32 %v291_v63, 0.0 }
 0x1ad   :  { %v791_v52 = vpop.f32.mrf.mxu1 }
 0x1ae   :  { %v313_v57 = vmax.f32 %v283_v53, 0.0  ;;  %v294_v60 = vadd.f32 %v791_v52, %v710_v51 }
 0x1af   :  { %v285_v54 = vpop.f32.mrf.mxu1 }
 0x1b0   :  { %v286_v55 = vadd.f32 %v710_v51, %v285_v54  ;;  %v316_v0 = vmax.f32 %v294_v60, 0.0 }
 0x1b1   :  { %v794_v56 = vpop.f32.mrf.mxu1 }
 0x1b2   :  { %v314_v58 = vmax.f32 %v286_v55, 0.0  ;;  %v322_v3 = vpack.c.bf16 %v316_v0, %v315_v2  ;;  %v307_v13 = vadd.f32 %v794_v56, %v710_v51 }
 0x1b3   :  { %v298_v59 = vpop.f32.mrf.mxu1 }
 0x1b4   :  { %v321_v61 = vpack.c.bf16 %v314_v58, %v313_v57  ;;  %v299_v5 = vadd.f32 %v710_v51, %v298_v59  ;;  %v319_v15 = vmax.f32 %v307_v13, 0.0 }
 0x1b5   :  { %v795_v62 = vpop.f32.mrf.mxu1 }
 0x1b6   :  { %454 = vmatmul.mubr.bf16.vlgmr.msra.gmra.mxu0 %v321_v61  ;;  %v317_v10 = vmax.f32 %v299_v5, 0.0  ;;  %v310_v11 = vadd.f32 %v795_v62, %v710_v51 }
 0x1b7   :  { %463 = vmatprep.mubr.bf16.mxu0 %v911_v48  ;;  %v301_v1 = vpop.f32.mrf.mxu1 }
 0x1b8   :  { %v302_v4 = vadd.f32 %v710_v51, %v301_v1  ;;  %v320_v14 = vmax.f32 %v310_v11, 0.0 }
 0x1ba   :  { %v318_v8 = vmax.f32 %v302_v4, 0.0  ;;  %v324_v16 = vpack.c.bf16 %v320_v14, %v319_v15 }
 0x1bc   :  { %v323_v12 = vpack.c.bf16 %v318_v8, %v317_v10 }
 0x1be   :  { %464 = vmatmul.mubr.bf16.gmra.mxu0 %v322_v3 }
 0x1bf   :  { %473 = vmatprep.mubr.bf16.mxu0 %v911_v48 }
 0x1c6   :  { %474 = vmatmul.mubr.bf16.gmra.mxu0 %v323_v12 }
 0x1c7   :  { %483 = vmatprep.mubr.bf16.mxu0 %v911_v48 }
 0x1ce   :  { %484 = vmatmul.mubr.bf16.gmra.mxu0 %v324_v16 }
 0x276   :  { %v455_v17 = vpop.f32.mrf.mxu0 }
 0x278   :  { %v457_v18 = vpop.f32.mrf.mxu0 }
 0x27a   :  { %v459_v19 = vpop.f32.mrf.mxu0 }
 0x27b   :  { %v494_v35 = vpack.c.bf16 %v459_v19, %v455_v17 }
 0x27c   :  { %v461_v20 = vpop.f32.mrf.mxu0 }
 0x27e   :  { %v465_v21 = vpop.f32.mrf.mxu0 }
 0x280   :  { %v467_v22 = vpop.f32.mrf.mxu0 }
 0x282   :  { %v469_v23 = vpop.f32.mrf.mxu0 }
 0x283   :  { %v495_v34 = vpack.c.bf16 %v469_v23, %v465_v21 }
 0x284   :  { %v471_v24 = vpop.f32.mrf.mxu0 }
 0x286   :  { %v475_v25 = vpop.f32.mrf.mxu0 }
 0x288   :  { %v477_v26 = vpop.f32.mrf.mxu0 }
 0x28a   :  { %v479_v27 = vpop.f32.mrf.mxu0 }
 0x28b   :  { %v496_v33 = vpack.c.bf16 %v479_v27, %v475_v25 }
 0x28c   :  { %v481_v28 = vpop.f32.mrf.mxu0 }
 0x28e   :  { %v485_v29 = vpop.f32.mrf.mxu0 }
 0x290   :  { %v487_v30 = vpop.f32.mrf.mxu0 }
 0x292   :  { %v489_v31 = vpop.f32.mrf.mxu0 }
 0x293   :  { %v497_v32 = vpack.c.bf16 %v489_v31, %v485_v29 }
 0x294   :  { %v491_v58 = vpop.f32.mrf.mxu0 }
 0x295   :  { %796 = vmatprep.subr.bf16.mxu1 %v497_v32 }
 0x296   :  { %797 = vmatpush3.bf16.msra.mxu1 %v497_v32 }
 0x297   :  { %798 = vmatprep.subr.bf16.mxu1 %v496_v33 }
 0x29a   :  { %799 = vmatpush3.bf16.msra.mxu1 %v496_v33 }
 0x29b   :  { %800 = vmatprep.subr.bf16.mxu1 %v495_v34 }
 0x29e   :  { %801 = vmatpush3.bf16.msra.mxu1 %v495_v34 }
 0x29f   :  { %802 = vmatprep.subr.bf16.mxu1 %v494_v35 }
 0x2a2   :  { %803 = vmatpush3.bf16.msra.mxu1 %v494_v35 }
 0x2a5   :  { %805 = vmatmul.mubr.msk.bf16.vlgmr.msra.gmra.mxu1 %vm98_vm0, %v972_v6 }
 0x2a6   :  { %808 = vmatprep.mubr.msk.bf16.mxu1 %vm98_vm0, %v977_v7 }
 0x2ad   :  { %809 = vmatmul.mubr.msk.bf16.gmra.mxu1 %vm98_vm0, %v986_v9 }
 0x365   :  { %v806_v38 = vpop.f32.mrf.mxu1 }
 0x366   :  { %v541_v40 = vadd.f32 %v806_v38, %v467_v22 }
 0x367   :  { %v532_v41 = vpop.f32.mrf.mxu1 }
 0x368   :  { %v533_v42 = vadd.f32 %v532_v41, %v457_v18  ;;  %v1063_v6 = vadd.f32 %v739_v39, %v541_v40 }
 0x369   :  { %v807_v43 = vpop.f32.mrf.mxu1 }
 0x36a   :  { %v544_v7 = vadd.f32 %v807_v43, %v471_v24  ;;  %v583_v9 = vsel %vm580_vm2, %v1063_v6, -1e+30  ;;  %v1068_v44 = vadd.f32 %v739_v39, %v533_v42 }
 0x36b   :  { %593 = vmax.xlane.f32.xlu0 %v583_v9  ;;  %v535_v45 = vpop.f32.mrf.mxu1 }
 0x36c   :  { %v536_v46 = vadd.f32 %v535_v45, %v461_v20  ;;  %v581_v48 = vsel %vm580_vm2, %v1068_v44, -1e+30  ;;  %v1075_v50 = vadd.f32 %v739_v39, %v544_v7 }
 0x36d   :  { %v810_v47 = vpop.f32.mrf.mxu1 }
 0x36e   :  { %v1073_v49 = vadd.f32 %v739_v39, %v536_v46  ;;  %v557_v52 = vadd.f32 %v810_v47, %v487_v30  ;;  %v584_v56 = vsel %vm580_vm2, %v1075_v50, -1e+30 }
 0x36f   :  { %v548_v51 = vpop.f32.mrf.mxu1  ;;  %589 = vmax.xlane.f32.xlu0 %v581_v48 }
 0x370   :  { %v549_v53 = vadd.f32 %v548_v51, %v477_v26  ;;  %v582_v54 = vsel %vm580_vm2, %v1073_v49, -1e+30  ;;  %v1088_v63 = vadd.f32 %v739_v39, %v557_v52 }
 0x371   :  { %v811_v55 = vpop.f32.mrf.mxu1  ;;  %591 = vmax.xlane.f32.xlu1 %v582_v54 }
 0x372   :  { %v1083_v57 = vadd.f32 %v739_v39, %v549_v53  ;;  %v560_v60 = vadd.f32 %v811_v55, %v491_v58  ;;  %v587_v1 = vsel %vm580_vm2, %v1088_v63, -1e+30 }
 0x373   :  { %v551_v59 = vpop.f32.mrf.mxu1  ;;  %595 = vmax.xlane.f32.xlu0 %v584_v56 }
 0x374   :  { %v552_v61 = vadd.f32 %v551_v59, %v481_v28  ;;  %v585_v62 = vsel %vm580_vm2, %v1083_v57, -1e+30  ;;  %v1098_v3 = vadd.f32 %v739_v39, %v560_v60 }
 0x375   :  { %597 = vmax.xlane.f32.xlu1 %v585_v62 }
 0x376   :  { %v1090_v0 = vadd.f32 %v739_v39, %v552_v61  ;;  %v588_v4 = vsel %vm580_vm2, %v1098_v3, -1e+30 }
 0x378   :  { %v586_v2 = vsel %vm580_vm2, %v1090_v0, -1e+30 }
 0x379   :  { %601 = vmax.xlane.f32.xlu1 %v587_v1  ;;  %599 = vmax.xlane.f32.xlu0 %v586_v2 }
 0x37d   :  { %603 = vmax.xlane.f32.xlu0 %v588_v4 }
 0x3f4   :  { %v1103_v5 = vpop.xlane.xlu0 %593 }
 0x3f5   :  { %v607_v8 = vsub.f32 %v583_v9, %v1103_v5  ;;  %v655_v58 = vsub.f32 %v1063_v6, %v1103_v5 }
 0x3f7   :  { %v617_v10 = vmul.f32 1.442695, %v607_v8 }
 0x3f8   :  { %v1106_v11 = vpop.xlane.xlu0 %589 }
 0x3f9   :  { %853 = vpow2.f32 %v617_v10  ;;  %v605_v12 = vsub.f32 %v581_v48, %v1106_v11 }
 0x3fa   :  { %v1109_v13 = vpop.xlane.xlu1 %591 }
 0x3fb   :  { %v613_v14 = vmul.f32 1.442695, %v605_v12  ;;  %v606_v15 = vsub.f32 %v582_v54, %v1109_v13 }
 0x3fc   :  { %v1112_v16 = vpop.xlane.xlu0 %595 }
 0x3fd   :  { %855 = vpow2.f32 %v613_v14  ;;  %v608_v17 = vsub.f32 %v584_v56, %v1112_v16  ;;  %v615_v18 = vmul.f32 1.442695, %v606_v15  ;;  %v656_v6 = vsub.f32 %v1075_v50, %v1112_v16 }
 0x3fe   :  { %v1115_v19 = vpop.xlane.xlu1 %597  ;;  %v654_v15 = vsub.f32 %v1073_v49, %v1109_v13 }
 0x3ff   :  { %v619_v20 = vmul.f32 1.442695, %v608_v17  ;;  %v609_v21 = vsub.f32 %v585_v62, %v1115_v19  ;;  %v653_v62 = vsub.f32 %v1068_v44, %v1106_v11  ;;  %v657_v44 = vsub.f32 %v1083_v57, %v1115_v19 }
 0x401   :  { %857 = vpow2.f32 %v619_v20  ;;  %v621_v22 = vmul.f32 1.442695, %v609_v21 }
 0x402   :  { %859 = vpow2.f32 %v615_v18  ;;  %v1118_v23 = vpop.xlane.xlu1 %601  ;;  %v1120_v24 = vpop.xlane.xlu0 %599 }
 0x403   :  { %861 = vpow2.f32 %v621_v22  ;;  %v611_v25 = vsub.f32 %v587_v1, %v1118_v23  ;;  %v610_v26 = vsub.f32 %v586_v2, %v1120_v24  ;;  %v659_v18 = vsub.f32 %v1088_v63, %v1118_v23 }
 0x404   :  { %v658_v49 = vsub.f32 %v1090_v0, %v1120_v24 }
 0x405   :  { %v625_v27 = vmul.f32 1.442695, %v611_v25  ;;  %v623_v28 = vmul.f32 1.442695, %v610_v26 }
 0x406   :  { %v854_v29 = vpop.eup %853  ;;  %v1124_v30 = vpop.xlane.xlu0 %603 }
 0x407   :  { %863 = vpow2.f32 %v625_v27  ;;  %v612_v31 = vsub.f32 %v588_v4, %v1124_v30  ;;  %v631_v32 = vsel %vm580_vm2, %v854_v29, 0.0  ;;  %v660_v23 = vsub.f32 %v1098_v3, %v1124_v30 }
 0x408   :  { %865 = vpow2.f32 %v623_v28  ;;  %641 = vadd.xlane.f32.xlu1 %v631_v32 }
 0x409   :  { %v627_v33 = vmul.f32 1.442695, %v612_v31 }
 0x40a   :  { %v856_v34 = vpop.eup %855 }
 0x40b   :  { %867 = vpow2.f32 %v627_v33  ;;  %v629_v35 = vsel %vm580_vm2, %v856_v34, 0.0 }
 0x40c   :  { %637 = vadd.xlane.f32.xlu1 %v629_v35 }
 0x40e   :  { %v858_v36 = vpop.eup %857 }
 0x40f   :  { %v860_v38 = vpop.eup %859  ;;  %v632_v39 = vsel %vm580_vm2, %v858_v36, 0.0 }
 0x410   :  { %v862_v40 = vpop.eup %861  ;;  %643 = vadd.xlane.f32.xlu0 %v632_v39  ;;  %v630_v42 = vsel %vm580_vm2, %v860_v38, 0.0 }
 0x411   :  { %v633_v41 = vsel %vm580_vm2, %v862_v40, 0.0 }
 0x412   :  { %645 = vadd.xlane.f32.xlu1 %v633_v41 }
 0x414   :  { %v864_v43 = vpop.eup %863  ;;  %639 = vadd.xlane.f32.xlu0 %v630_v42 }
 0x415   :  { %v866_v7 = vpop.eup %865  ;;  %v635_v9 = vsel %vm580_vm2, %v864_v43, 0.0 }
 0x416   :  { %649 = vadd.xlane.f32.xlu1 %v635_v9  ;;  %v634_v45 = vsel %vm580_vm2, %v866_v7, 0.0 }
 0x418   :  { %v868_v46 = vpop.eup %867  ;;  %647 = vadd.xlane.f32.xlu0 %v634_v45 }
 0x419   :  { %v636_v47 = vsel %vm580_vm2, %v868_v46, 0.0 }
 0x41c   :  { %651 = vadd.xlane.f32.xlu0 %v636_v47 }
 0x491   :  { %v642_v48 = vpop.xlane.xlu1 %641 }
 0x492   :  { %869 = vlog2.f32 %v642_v48 }
 0x495   :  { %v638_v51 = vpop.xlane.xlu1 %637 }
 0x496   :  { %871 = vlog2.f32 %v638_v51 }
 0x499   :  { %v644_v52 = vpop.xlane.xlu0 %643 }
 0x49a   :  { %873 = vlog2.f32 %v644_v52 }
 0x49b   :  { %v646_v53 = vpop.xlane.xlu1 %645 }
 0x49c   :  { %875 = vlog2.f32 %v646_v53 }
 0x49d   :  { %v640_v54 = vpop.xlane.xlu0 %639 }
 0x49e   :  { %877 = vlog2.f32 %v640_v54 }
 0x49f   :  { %v870_v55 = vpop.eup %869  ;;  %v650_v56 = vpop.xlane.xlu1 %649 }
 0x4a0   :  { %v666_v59 = vmul.f32 0.6931472, %v870_v55  ;;  %879 = vlog2.f32 %v650_v56 }
 0x4a1   :  { %v648_v37 = vpop.xlane.xlu0 %647 }
 0x4a2   :  { %v679_v60 = vsub.f32 %v655_v58, %v666_v59  ;;  %881 = vlog2.f32 %v648_v37 }
 0x4a3   :  { %v872_v61 = vpop.eup %871 }
 0x4a4   :  { %687 = vst [vmem:[%s1189_s6 + $0x10] sm:$0xff] %v679_v60  ;;  %v662_v1 = vmul.f32 0.6931472, %v872_v61 }
 0x4a5   :  { %v652_v2 = vpop.xlane.xlu0 %651 }
 0x4a6   :  { %v677_v4 = vsub.f32 %v653_v62, %v662_v1  ;;  %883 = vlog2.f32 %v652_v2 }
 0x4a7   :  { %v874_v8 = vpop.eup %873 }
 0x4a8   :  { %685 = vst [vmem:[%s1189_s6] sm:$0xff] %v677_v4  ;;  %v668_v5 = vmul.f32 0.6931472, %v874_v8 }
 0x4a9   :  { %v876_v10 = vpop.eup %875 }
 0x4aa   :  { %v680_v11 = vsub.f32 %v656_v6, %v668_v5  ;;  %v670_v12 = vmul.f32 0.6931472, %v876_v10 }
 0x4ab   :  { %v878_v14 = vpop.eup %877 }
 0x4ac   :  { %688 = vst [vmem:[%s1189_s6 + $0x18] sm:$0xff] %v680_v11  ;;  %v681_v50 = vsub.f32 %v657_v44, %v670_v12  ;;  %v664_v16 = vmul.f32 0.6931472, %v878_v14 }
 0x4ad   :  { %v880_v17 = vpop.eup %879 }
 0x4ae   :  { %689 = vst [vmem:[%s1189_s6 + $0x20] sm:$0xff] %v681_v50  ;;  %v678_v57 = vsub.f32 %v654_v15, %v664_v16  ;;  %v674_v19 = vmul.f32 0.6931472, %v880_v17 }
 0x4af   :  { %v882_v20 = vpop.eup %881 }
 0x4b0   :  { %686 = vst [vmem:[%s1189_s6 + $0x8] sm:$0xff] %v678_v57  ;;  %v683_v13 = vsub.f32 %v659_v18, %v674_v19  ;;  %v672_v21 = vmul.f32 0.6931472, %v882_v20 }
 0x4b2   :  { %691 = vst [vmem:[%s1189_s6 + $0x30] sm:$0xff] %v683_v13  ;;  %v682_v63 = vsub.f32 %v658_v49, %v672_v21 }
 0x4b3   :  { %v884_v22 = vpop.eup %883 }
 0x4b4   :  { %690 = vst [vmem:[%s1189_s6 + $0x28] sm:$0xff] %v682_v63  ;;  %v676_v0 = vmul.f32 0.6931472, %v884_v22 }
 0x4b6   :  { %v684_v24 = vsub.f32 %v660_v23, %v676_v0 }
 0x4b8   :  { %692 = vst [vmem:[%s1189_s6 + $0x38] sm:$0xff] %v684_v24 }
 0x4b9   :  { %697 = vsyncpa [#allocation3], 1 }

</bundles_post_ra>
